<compile_context>
chip_gen: v6e
topology: v6e:2x2x1
jax: 0.10.0
libtpu: 0.0.40
codegen_flags: <defaults>
</compile_context>

<pallas_src>
import functools

import jax
import jax.numpy as jnp
from jax import lax
from jax.experimental import pallas as pl
from jax.experimental.pallas import tpu as pltpu


# --------------------------------------------------------------------------- #
# Kernel body
# --------------------------------------------------------------------------- #
def _rpn_body(x_ref, top_ref, bot_ref, w3_ref, b3_ref, wh_ref, bh_ref,
              out_ref, xpad_ref, *, W, THW, PL):
    i = pl.program_id(1)
    n_i = pl.num_programs(1)
    C = x_ref.shape[1]

    # Tile interior at a 128-aligned lane offset -> unmasked bulk store.
    xpad_ref[:, PL:PL + THW] = x_ref[0].astype(jnp.bfloat16)

    # One-row top/bottom halos (zeros at the image border).
    if top_ref is None:
        top = jnp.zeros((C, W), jnp.bfloat16)
        bot = jnp.zeros((C, W), jnp.bfloat16)
    else:
        top = jnp.where(i > 0, top_ref[0, :, 7, :].astype(jnp.bfloat16), 0)
        bot = jnp.where(i < n_i - 1, bot_ref[0, :, 0, :].astype(jnp.bfloat16), 0)
    xpad_ref[:, PL - W:PL] = top
    xpad_ref[:, PL + THW:PL + THW + W] = bot

    # Left/right image-border masks over the flattened (h*W + w) lane axis.
    col = lax.broadcasted_iota(jnp.int32, (1, THW), 1) % W
    mask_l = col > 0           # valid lanes for a kx = -1 tap
    mask_r = col < (W - 1)     # valid lanes for a kx = +1 tap

    # 3x3 conv: nine accumulated (Cout, Cin) @ (Cin, TH*W) MXU matmuls.
    acc = None
    for ky in range(3):
        for kx in range(3):
            start = PL + (ky - 1) * W + (kx - 1)
            tap = xpad_ref[:, start:start + THW]
            if kx == 0:
                tap = jnp.where(mask_l, tap, 0)
            elif kx == 2:
                tap = jnp.where(mask_r, tap, 0)
            part = jnp.dot(w3_ref[ky, kx], tap,
                           preferred_element_type=jnp.float32)
            acc = part if acc is None else acc + part

    # Bias + ReLU; drop to bf16 immediately (smaller live f32 footprint).
    t = jnp.maximum(acc + b3_ref[...], 0.0).astype(jnp.bfloat16)     # (C, TH*W)

    # Fused cls+bbox 1x1 heads, already lane-dense: (5A, C) @ (C, TH*W).
    out_ref[0] = jnp.dot(wh_ref[...], t,
                         preferred_element_type=jnp.float32) + bh_ref[...]


def _make_kernel(*, W, THW, PL, has_halo):
    if has_halo:
        def kernel(x_ref, top_ref, bot_ref, w3_ref, b3_ref, wh_ref, bh_ref,
                   out_ref, xpad_ref):
            _rpn_body(x_ref, top_ref, bot_ref, w3_ref, b3_ref, wh_ref, bh_ref,
                      out_ref, xpad_ref, W=W, THW=THW, PL=PL)
    else:
        def kernel(x_ref, w3_ref, b3_ref, wh_ref, bh_ref, out_ref, xpad_ref):
            _rpn_body(x_ref, None, None, w3_ref, b3_ref, wh_ref, bh_ref,
                      out_ref, xpad_ref, W=W, THW=THW, PL=PL)
    return kernel


# --------------------------------------------------------------------------- #
# Tiling / VMEM budgeting helpers
# --------------------------------------------------------------------------- #
def _round_up(x, m):
    return (x + m - 1) // m * m


def _vmem_budget_bytes():
    cap = 128 * 1024 * 1024
    try:
        cap = int(pltpu.get_tpu_info().vmem_capacity_bytes)
    except Exception:
        pass
    # Never ask for the whole VMEM (critical on v7x's 64 MiB); cap at ~100 MiB
    # on the 128 MiB generations.
    return max(min((cap * 3) // 4, 100 * 1024 * 1024), 8 * 1024 * 1024)


def _pick_tile_rows(H, W, C, A, budget_bytes):
    """Largest TH (divisor of H, TH%8==0, TH*W%128==0) whose tile fits the budget."""
    # Rough per-output-row working set: double-buffered f32 input block, bf16
    # slab scratch, f32 conv accumulator + bf16 copy + live taps, and the
    # double-buffered f32 fused-head output block.
    per_row = W * (C * 20 + 5 * A * 8) + 1
    max_rows = max(int(budget_bytes * 0.7) // per_row, 1)
    if max_rows >= H:
        return H
    for th in range(min(H, max_rows), 0, -1):
        if H % th == 0 and th % 8 == 0 and (th * W) % 128 == 0:
            return th
    # TODO(synk): masked partial tiles for awkward H/W; fall back to whole image.
    return H


# --------------------------------------------------------------------------- #
# Wrapper
# --------------------------------------------------------------------------- #
@jax.jit
def rpn_head_single(x_nchw, params):
    """One feature map (N, C, H, W) f32 -> (logits (N,A,H,W), bbox (N,4A,H,W)) f32."""
    w3_oihw, b3, wc_oihw, bc, wb_oihw, bb = params
    N, C, H, W = x_nchw.shape
    A = wc_oihw.shape[0]

    budget = _vmem_budget_bytes()
    TH = _pick_tile_rows(H, W, C, A, budget)
    n_h = H // TH
    has_halo = n_h > 1
    THW = TH * W
    PL = _round_up(W + 1, 128)       # 128-aligned left pad of the slab scratch

    # Weight layout glue (tiny tensors, plain XLA).
    w3_k = jnp.transpose(w3_oihw, (2, 3, 0, 1)).astype(jnp.bfloat16)   # (3,3,Cout,Cin)
    wh = jnp.concatenate([wc_oihw[:, :, 0, 0], wb_oihw[:, :, 0, 0]],
                         axis=0).astype(jnp.bfloat16)                   # (5A, Cin)
    b3_2d = b3.reshape(C, 1).astype(jnp.float32)
    bh_2d = jnp.concatenate([bc, bb]).reshape(5 * A, 1).astype(jnp.float32)

    # Metadata-only view; activations stay NCHW in HBM (no transpose pass) and
    # are cast to bf16 inside the kernel (single f32 HBM read).
    x3 = x_nchw.reshape(N, C, H * W)

    inputs = [x3]
    in_specs = [pl.BlockSpec((1, C, THW), lambda n, i: (n, 0, i))]
    if has_halo:
        tpb = TH // 8                 # 8-row input blocks per tile (TH % 8 == 0)
        hb_last = H // 8 - 1
        in_specs += [
            pl.BlockSpec((1, C, 8, W),
                         lambda n, i: (n, 0, jnp.maximum(i * tpb - 1, 0), 0)),
            pl.BlockSpec((1, C, 8, W),
                         lambda n, i: (n, 0, jnp.minimum((i + 1) * tpb, hb_last), 0)),
        ]
        inputs += [x_nchw, x_nchw]
    in_specs += [
        pl.BlockSpec((3, 3, C, C), lambda n, i: (0, 0, 0, 0)),
        pl.BlockSpec((C, 1), lambda n, i: (0, 0)),
        pl.BlockSpec((5 * A, C), lambda n, i: (0, 0)),
        pl.BlockSpec((5 * A, 1), lambda n, i: (0, 0)),
    ]
    inputs += [w3_k, b3_2d, wh, bh_2d]

    kernel = _make_kernel(W=W, THW=THW, PL=PL, has_halo=has_halo)

    head = pl.pallas_call(
        kernel,
        out_shape=jax.ShapeDtypeStruct((N, 5 * A, H * W), jnp.float32),
        grid=(N, n_h),
        in_specs=in_specs,
        out_specs=pl.BlockSpec((1, 5 * A, THW), lambda n, i: (n, 0, i)),
        scratch_shapes=[pltpu.VMEM((C, PL + THW + PL), jnp.bfloat16)],
        compiler_params=pltpu.CompilerParams(
            dimension_semantics=("parallel", "parallel"),
            vmem_limit_bytes=budget),
    )(*inputs)

    # Split fused head + metadata-only reshapes back to NCHW.
    logits = head[:, :A, :].reshape(N, A, H, W)
    bbox = head[:, A:, :].reshape(N, 4 * A, H, W)
    return logits, bbox


def rpn_head_forward(features, params):
    """features: list of NCHW arrays -> (list of logits, list of bbox_reg)."""
    logits, bbox_reg = [], []
    for f in features:
        lg, bb = rpn_head_single(f, params)
        logits.append(lg)
        bbox_reg.append(bb)
    return logits, bbox_reg


# ---------------- reference (pure JAX/XLA, f32) for correctness check ---------------- #
def _ref_single(x_nchw, params):
    w3, b3, wc, bc, wb, bb = params
    dn = ("NCHW", "OIHW", "NCHW")
    t = lax.conv_general_dilated(x_nchw.astype(jnp.float32), w3.astype(jnp.float32),
                                 (1, 1), ((1, 1), (1, 1)), dimension_numbers=dn)
    t = jnp.maximum(t + b3[None, :, None, None], 0.0)
    lg = lax.conv_general_dilated(t, wc.astype(jnp.float32), (1, 1), ((0, 0), (0, 0)),
                                  dimension_numbers=dn) + bc[None, :, None, None]
    bbx = lax.conv_general_dilated(t, wb.astype(jnp.float32), (1, 1), ((0, 0), (0, 0)),
                                   dimension_numbers=dn) + bb[None, :, None, None]
    return lg, bbx


def init_rpn_head_params(key, in_channels, num_anchors):
    """Deterministic init matching RPNHead.__init__: normal(std=0.01) weights, zero bias."""
    k1, k2, k3 = jax.random.split(key, 3)
    w3 = 0.01 * jax.random.normal(k1, (in_channels, in_channels, 3, 3), jnp.float32)
    b3 = jnp.zeros((in_channels,), jnp.float32)
    wc = 0.01 * jax.random.normal(k2, (num_anchors, in_channels, 1, 1), jnp.float32)
    bc = jnp.zeros((num_anchors,), jnp.float32)
    wb = 0.01 * jax.random.normal(k3, (num_anchors * 4, in_channels, 1, 1), jnp.float32)
    bb = jnp.zeros((num_anchors * 4,), jnp.float32)
    return (w3, b3, wc, bc, wb, bb)


if __name__ == "__main__":
    key = jax.random.PRNGKey(0)
    kp, kx1, kx2 = jax.random.split(key, 3)

    in_channels = 16
    num_anchors = 3
    params = init_rpn_head_params(kp, in_channels, num_anchors)

    # FPN-style list of feature maps at two scales (NCHW, like PyTorch).
    x1 = jax.random.normal(kx1, (2, in_channels, 16, 16), jnp.float32)
    x2 = jax.random.normal(kx2, (2, in_channels, 8, 8), jnp.float32)
    features = [x1, x2]

    logits, bbox_reg = rpn_head_forward(features, params)
    jax.block_until_ready((logits, bbox_reg))

    # Correctness vs. the f32 XLA reference; tolerance loosened for bf16 matmuls.
    ok = True
    for f, lg, bb in zip(features, logits, bbox_reg):
        lg_ref, bb_ref = _ref_single(f, params)
        ok &= bool(jnp.allclose(lg, lg_ref, atol=2e-2, rtol=2e-2))
        ok &= bool(jnp.allclose(bb, bb_ref, atol=2e-2, rtol=2e-2))
        assert lg.shape == (f.shape[0], num_anchors, f.shape[2], f.shape[3])
        assert bb.shape == (f.shape[0], num_anchors * 4, f.shape[2], f.shape[3])

    if ok:
        print("KERNEL_OK")
    else:
        print("MISMATCH")
</pallas_src>

<mosaic_0001>
module attributes {stable_mosaic.version = 11 : i64} {
  func.func @kernel(%arg0: i32, %arg1: i32, %arg2: memref<1x16x256xf32, #tpu.memory_space<vmem>>, %arg3: memref<3x3x16x16xbf16, #tpu.memory_space<vmem>>, %arg4: memref<16x1xf32, #tpu.memory_space<vmem>>, %arg5: memref<15x16xbf16, #tpu.memory_space<vmem>>, %arg6: memref<15x1xf32, #tpu.memory_space<vmem>>, %arg7: memref<1x15x256xf32, #tpu.memory_space<vmem>>, %arg8: memref<16x512xbf16, #tpu.memory_space<vmem>>) attributes {dimension_semantics = [#tpu.dimension_semantics<parallel>, #tpu.dimension_semantics<parallel>], iteration_bounds = array<i64: 2, 1>, scalar_prefetch = 0 : i64, scratch_operands = 1 : i64, tpu.core_type = #tpu.core_type<tc>, window_params = [{transform_indices = @transform_0, window_bounds = array<i64: 1, 16, 256>}, {pipeline_mode = #tpu.pipeline_mode<synchronous>, transform_indices = @transform_1, window_bounds = array<i64: 3, 3, 16, 16>}, {pipeline_mode = #tpu.pipeline_mode<synchronous>, transform_indices = @transform_2, window_bounds = array<i64: 16, 1>}, {pipeline_mode = #tpu.pipeline_mode<synchronous>, transform_indices = @transform_3, window_bounds = array<i64: 15, 16>}, {pipeline_mode = #tpu.pipeline_mode<synchronous>, transform_indices = @transform_4, window_bounds = array<i64: 15, 1>}, {transform_indices = @transform_5, window_bounds = array<i64: 1, 15, 256>}]} {
    %c0 = arith.constant 0 : index
    %c0_0 = arith.constant 0 : index
    %c0_1 = arith.constant 0 : index
    %0 = vector.load %arg2[%c0, %c0_0, %c0_1] : memref<1x16x256xf32, #tpu.memory_space<vmem>>, vector<1x16x256xf32>
    %1 = vector.shape_cast %0 : vector<1x16x256xf32> to vector<16x256xf32>
    %2 = arith.truncf %1 : vector<16x256xf32> to vector<16x256xbf16>
    %c0_2 = arith.constant 0 : index
    %c128 = arith.constant 128 : index
    %3 = vector.load %arg8[%c0_2, %c128] : memref<16x512xbf16, #tpu.memory_space<vmem>>, vector<16x256xbf16>
    tpu.vector_store %arg8[%c0_2, %c128], %2 {strides = array<i32>} : memref<16x512xbf16, #tpu.memory_space<vmem>>, vector<16x256xbf16>,
    %cst = arith.constant 0.000000e+00 : bf16
    %4 = vector.broadcast %cst : bf16 to vector<16x16xbf16>
    %cst_3 = arith.constant 0.000000e+00 : bf16
    %5 = vector.broadcast %cst_3 : bf16 to vector<16x16xbf16>
    %c0_4 = arith.constant 0 : index
    %c112 = arith.constant 112 : index
    %6 = vector.load %arg8[%c0_4, %c112] : memref<16x512xbf16, #tpu.memory_space<vmem>>, vector<16x16xbf16>
    tpu.vector_store %arg8[%c0_4, %c112], %4 {strides = array<i32>} : memref<16x512xbf16, #tpu.memory_space<vmem>>, vector<16x16xbf16>,
    %c0_5 = arith.constant 0 : index
    %c384 = arith.constant 384 : index
    %7 = vector.load %arg8[%c0_5, %c384] : memref<16x512xbf16, #tpu.memory_space<vmem>>, vector<16x16xbf16>
    tpu.vector_store %arg8[%c0_5, %c384], %5 {strides = array<i32>} : memref<16x512xbf16, #tpu.memory_space<vmem>>, vector<16x16xbf16>,
    %8 = tpu.iota {dimensions = array<i32: 1>} : vector<1x256xi32>
    %c16_i32 = arith.constant 16 : i32
    %c0_i32 = arith.constant 0 : i32
    %9 = arith.cmpi eq, %c16_i32, %c0_i32 : i32
    %c1_i32 = arith.constant 1 : i32
    %10 = arith.select %9, %c1_i32, %c16_i32 : i32
    %11 = vector.broadcast %10 : i32 to vector<1x256xi32>
    %12 = arith.remsi %8, %11 : vector<1x256xi32>
    %c0_i32_6 = arith.constant 0 : i32
    %13 = vector.broadcast %c0_i32_6 : i32 to vector<1x256xi32>
    %14 = arith.cmpi ne, %12, %13 : vector<1x256xi32>
    %c0_i32_7 = arith.constant 0 : i32
    %15 = vector.broadcast %c0_i32_7 : i32 to vector<1x256xi32>
    %16 = arith.cmpi slt, %12, %15 : vector<1x256xi32>
    %c0_i32_8 = arith.constant 0 : i32
    %17 = arith.cmpi slt, %10, %c0_i32_8 : i32
    %18 = vector.broadcast %17 : i1 to vector<1x256xi1>
    %19 = vector.broadcast %18 : vector<1x256xi1> to vector<1x256xi1>
    %20 = arith.xori %16, %19 : vector<1x256xi1>
    %21 = arith.andi %20, %14 : vector<1x256xi1>
    %22 = vector.broadcast %10 : i32 to vector<1x256xi32>
    %23 = arith.addi %12, %22 : vector<1x256xi32>
    %24 = arith.select %21, %23, %12 : vector<1x256xi1>, vector<1x256xi32>
    %c0_i32_9 = arith.constant 0 : i32
    %25 = vector.broadcast %c0_i32_9 : i32 to vector<1x256xi32>
    %26 = arith.cmpi sgt, %24, %25 : vector<1x256xi32>
    %c15_i32 = arith.constant 15 : i32
    %27 = vector.broadcast %c15_i32 : i32 to vector<1x256xi32>
    %28 = arith.cmpi slt, %24, %27 : vector<1x256xi32>
    %c0_10 = arith.constant 0 : index
    %c111 = arith.constant 111 : index
    %29 = vector.load %arg8[%c0_10, %c111] : memref<16x512xbf16, #tpu.memory_space<vmem>>, vector<16x256xbf16>
    %c0_i32_11 = arith.constant 0 : i32
    %30 = arith.sitofp %c0_i32_11 : i32 to bf16
    %31 = vector.shape_cast %26 : vector<1x256xi1> to vector<1x256xi1>
    %32 = vector.broadcast %31 : vector<1x256xi1> to vector<16x256xi1>
    %33 = vector.broadcast %30 : bf16 to vector<16x256xbf16>
    %34 = arith.select %32, %29, %33 : vector<16x256xi1>, vector<16x256xbf16>
    %c0_12 = arith.constant 0 : index
    %c0_13 = arith.constant 0 : index
    %c0_14 = arith.constant 0 : index
    %c0_15 = arith.constant 0 : index
    %35 = vector.load %arg3[%c0_12, %c0_13, %c0_14, %c0_15] : memref<3x3x16x16xbf16, #tpu.memory_space<vmem>>, vector<1x1x16x16xbf16>
    %36 = vector.shape_cast %35 : vector<1x1x16x16xbf16> to vector<16x16xbf16>
    %cst_16 = arith.constant dense<0.000000e+00> : vector<16x256xf32>
    %37 = tpu.matmul %36, %34, %cst_16 {dimension_numbers = #tpu.dot_dimension_numbers<[1], [0], [0], [1], [0, 0, 1, 1], [], []>} : vector<16x16xbf16>, vector<16x256xbf16>, vector<16x256xf32> -> vector<16x256xf32>
    %c0_17 = arith.constant 0 : index
    %c112_18 = arith.constant 112 : index
    %38 = vector.load %arg8[%c0_17, %c112_18] : memref<16x512xbf16, #tpu.memory_space<vmem>>, vector<16x256xbf16>
    %c0_19 = arith.constant 0 : index
    %c1 = arith.constant 1 : index
    %c0_20 = arith.constant 0 : index
    %c0_21 = arith.constant 0 : index
    %39 = vector.load %arg3[%c0_19, %c1, %c0_20, %c0_21] : memref<3x3x16x16xbf16, #tpu.memory_space<vmem>>, vector<1x1x16x16xbf16>
    %40 = vector.shape_cast %39 : vector<1x1x16x16xbf16> to vector<16x16xbf16>
    %cst_22 = arith.constant dense<0.000000e+00> : vector<16x256xf32>
    %41 = tpu.matmul %40, %38, %cst_22 {dimension_numbers = #tpu.dot_dimension_numbers<[1], [0], [0], [1], [0, 0, 1, 1], [], []>} : vector<16x16xbf16>, vector<16x256xbf16>, vector<16x256xf32> -> vector<16x256xf32>
    %42 = arith.addf %37, %41 : vector<16x256xf32>
    %c0_23 = arith.constant 0 : index
    %c113 = arith.constant 113 : index
    %43 = vector.load %arg8[%c0_23, %c113] : memref<16x512xbf16, #tpu.memory_space<vmem>>, vector<16x256xbf16>
    %c0_i32_24 = arith.constant 0 : i32
    %44 = arith.sitofp %c0_i32_24 : i32 to bf16
    %45 = vector.shape_cast %28 : vector<1x256xi1> to vector<1x256xi1>
    %46 = vector.broadcast %45 : vector<1x256xi1> to vector<16x256xi1>
    %47 = vector.broadcast %44 : bf16 to vector<16x256xbf16>
    %48 = arith.select %46, %43, %47 : vector<16x256xi1>, vector<16x256xbf16>
    %c0_25 = arith.constant 0 : index
    %c2 = arith.constant 2 : index
    %c0_26 = arith.constant 0 : index
    %c0_27 = arith.constant 0 : index
    %49 = vector.load %arg3[%c0_25, %c2, %c0_26, %c0_27] : memref<3x3x16x16xbf16, #tpu.memory_space<vmem>>, vector<1x1x16x16xbf16>
    %50 = vector.shape_cast %49 : vector<1x1x16x16xbf16> to vector<16x16xbf16>
    %cst_28 = arith.constant dense<0.000000e+00> : vector<16x256xf32>
    %51 = tpu.matmul %50, %48, %cst_28 {dimension_numbers = #tpu.dot_dimension_numbers<[1], [0], [0], [1], [0, 0, 1, 1], [], []>} : vector<16x16xbf16>, vector<16x256xbf16>, vector<16x256xf32> -> vector<16x256xf32>
    %52 = arith.addf %42, %51 : vector<16x256xf32>
    %c0_29 = arith.constant 0 : index
    %c127 = arith.constant 127 : index
    %53 = vector.load %arg8[%c0_29, %c127] : memref<16x512xbf16, #tpu.memory_space<vmem>>, vector<16x256xbf16>
    %c0_i32_30 = arith.constant 0 : i32
    %54 = arith.sitofp %c0_i32_30 : i32 to bf16
    %55 = vector.shape_cast %26 : vector<1x256xi1> to vector<1x256xi1>
    %56 = vector.broadcast %55 : vector<1x256xi1> to vector<16x256xi1>
    %57 = vector.broadcast %54 : bf16 to vector<16x256xbf16>
    %58 = arith.select %56, %53, %57 : vector<16x256xi1>, vector<16x256xbf16>
    %c1_31 = arith.constant 1 : index
    %c0_32 = arith.constant 0 : index
    %c0_33 = arith.constant 0 : index
    %c0_34 = arith.constant 0 : index
    %59 = vector.load %arg3[%c1_31, %c0_32, %c0_33, %c0_34] : memref<3x3x16x16xbf16, #tpu.memory_space<vmem>>, vector<1x1x16x16xbf16>
    %60 = vector.shape_cast %59 : vector<1x1x16x16xbf16> to vector<16x16xbf16>
    %cst_35 = arith.constant dense<0.000000e+00> : vector<16x256xf32>
    %61 = tpu.matmul %60, %58, %cst_35 {dimension_numbers = #tpu.dot_dimension_numbers<[1], [0], [0], [1], [0, 0, 1, 1], [], []>} : vector<16x16xbf16>, vector<16x256xbf16>, vector<16x256xf32> -> vector<16x256xf32>
    %62 = arith.addf %52, %61 : vector<16x256xf32>
    %c0_36 = arith.constant 0 : index
    %c128_37 = arith.constant 128 : index
    %63 = vector.load %arg8[%c0_36, %c128_37] : memref<16x512xbf16, #tpu.memory_space<vmem>>, vector<16x256xbf16>
    %c1_38 = arith.constant 1 : index
    %c1_39 = arith.constant 1 : index
    %c0_40 = arith.constant 0 : index
    %c0_41 = arith.constant 0 : index
    %64 = vector.load %arg3[%c1_38, %c1_39, %c0_40, %c0_41] : memref<3x3x16x16xbf16, #tpu.memory_space<vmem>>, vector<1x1x16x16xbf16>
    %65 = vector.shape_cast %64 : vector<1x1x16x16xbf16> to vector<16x16xbf16>
    %cst_42 = arith.constant dense<0.000000e+00> : vector<16x256xf32>
    %66 = tpu.matmul %65, %63, %cst_42 {dimension_numbers = #tpu.dot_dimension_numbers<[1], [0], [0], [1], [0, 0, 1, 1], [], []>} : vector<16x16xbf16>, vector<16x256xbf16>, vector<16x256xf32> -> vector<16x256xf32>
    %67 = arith.addf %62, %66 : vector<16x256xf32>
    %c0_43 = arith.constant 0 : index
    %c129 = arith.constant 129 : index
    %68 = vector.load %arg8[%c0_43, %c129] : memref<16x512xbf16, #tpu.memory_space<vmem>>, vector<16x256xbf16>
    %c0_i32_44 = arith.constant 0 : i32
    %69 = arith.sitofp %c0_i32_44 : i32 to bf16
    %70 = vector.shape_cast %28 : vector<1x256xi1> to vector<1x256xi1>
    %71 = vector.broadcast %70 : vector<1x256xi1> to vector<16x256xi1>
    %72 = vector.broadcast %69 : bf16 to vector<16x256xbf16>
    %73 = arith.select %71, %68, %72 : vector<16x256xi1>, vector<16x256xbf16>
    %c1_45 = arith.constant 1 : index
    %c2_46 = arith.constant 2 : index
    %c0_47 = arith.constant 0 : index
    %c0_48 = arith.constant 0 : index
    %74 = vector.load %arg3[%c1_45, %c2_46, %c0_47, %c0_48] : memref<3x3x16x16xbf16, #tpu.memory_space<vmem>>, vector<1x1x16x16xbf16>
    %75 = vector.shape_cast %74 : vector<1x1x16x16xbf16> to vector<16x16xbf16>
    %cst_49 = arith.constant dense<0.000000e+00> : vector<16x256xf32>
    %76 = tpu.matmul %75, %73, %cst_49 {dimension_numbers = #tpu.dot_dimension_numbers<[1], [0], [0], [1], [0, 0, 1, 1], [], []>} : vector<16x16xbf16>, vector<16x256xbf16>, vector<16x256xf32> -> vector<16x256xf32>
    %77 = arith.addf %67, %76 : vector<16x256xf32>
    %c0_50 = arith.constant 0 : index
    %c143 = arith.constant 143 : index
    %78 = vector.load %arg8[%c0_50, %c143] : memref<16x512xbf16, #tpu.memory_space<vmem>>, vector<16x256xbf16>
    %c0_i32_51 = arith.constant 0 : i32
    %79 = arith.sitofp %c0_i32_51 : i32 to bf16
    %80 = vector.shape_cast %26 : vector<1x256xi1> to vector<1x256xi1>
    %81 = vector.broadcast %80 : vector<1x256xi1> to vector<16x256xi1>
    %82 = vector.broadcast %79 : bf16 to vector<16x256xbf16>
    %83 = arith.select %81, %78, %82 : vector<16x256xi1>, vector<16x256xbf16>
    %c2_52 = arith.constant 2 : index
    %c0_53 = arith.constant 0 : index
    %c0_54 = arith.constant 0 : index
    %c0_55 = arith.constant 0 : index
    %84 = vector.load %arg3[%c2_52, %c0_53, %c0_54, %c0_55] : memref<3x3x16x16xbf16, #tpu.memory_space<vmem>>, vector<1x1x16x16xbf16>
    %85 = vector.shape_cast %84 : vector<1x1x16x16xbf16> to vector<16x16xbf16>
    %cst_56 = arith.constant dense<0.000000e+00> : vector<16x256xf32>
    %86 = tpu.matmul %85, %83, %cst_56 {dimension_numbers = #tpu.dot_dimension_numbers<[1], [0], [0], [1], [0, 0, 1, 1], [], []>} : vector<16x16xbf16>, vector<16x256xbf16>, vector<16x256xf32> -> vector<16x256xf32>
    %87 = arith.addf %77, %86 : vector<16x256xf32>
    %c0_57 = arith.constant 0 : index
    %c144 = arith.constant 144 : index
    %88 = vector.load %arg8[%c0_57, %c144] : memref<16x512xbf16, #tpu.memory_space<vmem>>, vector<16x256xbf16>
    %c2_58 = arith.constant 2 : index
    %c1_59 = arith.constant 1 : index
    %c0_60 = arith.constant 0 : index
    %c0_61 = arith.constant 0 : index
    %89 = vector.load %arg3[%c2_58, %c1_59, %c0_60, %c0_61] : memref<3x3x16x16xbf16, #tpu.memory_space<vmem>>, vector<1x1x16x16xbf16>
    %90 = vector.shape_cast %89 : vector<1x1x16x16xbf16> to vector<16x16xbf16>
    %cst_62 = arith.constant dense<0.000000e+00> : vector<16x256xf32>
    %91 = tpu.matmul %90, %88, %cst_62 {dimension_numbers = #tpu.dot_dimension_numbers<[1], [0], [0], [1], [0, 0, 1, 1], [], []>} : vector<16x16xbf16>, vector<16x256xbf16>, vector<16x256xf32> -> vector<16x256xf32>
    %92 = arith.addf %87, %91 : vector<16x256xf32>
    %c0_63 = arith.constant 0 : index
    %c145 = arith.constant 145 : index
    %93 = vector.load %arg8[%c0_63, %c145] : memref<16x512xbf16, #tpu.memory_space<vmem>>, vector<16x256xbf16>
    %c0_i32_64 = arith.constant 0 : i32
    %94 = arith.sitofp %c0_i32_64 : i32 to bf16
    %95 = vector.shape_cast %28 : vector<1x256xi1> to vector<1x256xi1>
    %96 = vector.broadcast %95 : vector<1x256xi1> to vector<16x256xi1>
    %97 = vector.broadcast %94 : bf16 to vector<16x256xbf16>
    %98 = arith.select %96, %93, %97 : vector<16x256xi1>, vector<16x256xbf16>
    %c2_65 = arith.constant 2 : index
    %c2_66 = arith.constant 2 : index
    %c0_67 = arith.constant 0 : index
    %c0_68 = arith.constant 0 : index
    %99 = vector.load %arg3[%c2_65, %c2_66, %c0_67, %c0_68] : memref<3x3x16x16xbf16, #tpu.memory_space<vmem>>, vector<1x1x16x16xbf16>
    %100 = vector.shape_cast %99 : vector<1x1x16x16xbf16> to vector<16x16xbf16>
    %cst_69 = arith.constant dense<0.000000e+00> : vector<16x256xf32>
    %101 = tpu.matmul %100, %98, %cst_69 {dimension_numbers = #tpu.dot_dimension_numbers<[1], [0], [0], [1], [0, 0, 1, 1], [], []>} : vector<16x16xbf16>, vector<16x256xbf16>, vector<16x256xf32> -> vector<16x256xf32>
    %102 = arith.addf %92, %101 : vector<16x256xf32>
    %c0_70 = arith.constant 0 : index
    %c0_71 = arith.constant 0 : index
    %103 = vector.load %arg4[%c0_70, %c0_71] : memref<16x1xf32, #tpu.memory_space<vmem>>, vector<16x1xf32>
    %104 = vector.broadcast %103 : vector<16x1xf32> to vector<16x256xf32>
    %105 = arith.addf %102, %104 : vector<16x256xf32>
    %cst_72 = arith.constant 0.000000e+00 : f32
    %106 = vector.broadcast %cst_72 : f32 to vector<16x256xf32>
    %107 = arith.maximumf %105, %106 : vector<16x256xf32>
    %108 = arith.truncf %107 : vector<16x256xf32> to vector<16x256xbf16>
    %c0_73 = arith.constant 0 : index
    %c0_74 = arith.constant 0 : index
    %109 = vector.load %arg5[%c0_73, %c0_74] : memref<15x16xbf16, #tpu.memory_space<vmem>>, vector<15x16xbf16>
    %cst_75 = arith.constant dense<0.000000e+00> : vector<15x256xf32>
    %110 = tpu.matmul %109, %108, %cst_75 {dimension_numbers = #tpu.dot_dimension_numbers<[1], [0], [0], [1], [0, 0, 1, 1], [], []>} : vector<15x16xbf16>, vector<16x256xbf16>, vector<15x256xf32> -> vector<15x256xf32>
    %c0_76 = arith.constant 0 : index
    %c0_77 = arith.constant 0 : index
    %111 = vector.load %arg6[%c0_76, %c0_77] : memref<15x1xf32, #tpu.memory_space<vmem>>, vector<15x1xf32>
    %112 = vector.broadcast %111 : vector<15x1xf32> to vector<15x256xf32>
    %113 = arith.addf %110, %112 : vector<15x256xf32>
    %c0_78 = arith.constant 0 : index
    %c0_79 = arith.constant 0 : index
    %c0_80 = arith.constant 0 : index
    %114 = vector.load %arg7[%c0_78, %c0_79, %c0_80] : memref<1x15x256xf32, #tpu.memory_space<vmem>>, vector<1x15x256xf32>
    %115 = vector.shape_cast %114 : vector<1x15x256xf32> to vector<15x256xf32>
    %116 = vector.shape_cast %113 : vector<15x256xf32> to vector<1x15x256xf32>
    tpu.vector_store %arg7[%c0_78, %c0_79, %c0_80], %116 {strides = array<i32>} : memref<1x15x256xf32, #tpu.memory_space<vmem>>, vector<1x15x256xf32>,
    return
  }
  func.func @transform_0(%arg0: i32, %arg1: i32) -> (i32, i32, i32) {
    %c0_i32 = arith.constant 0 : i32
    %c0_i32_0 = arith.constant 0 : i32
    return %arg0, %c0_i32, %arg1 : i32, i32, i32
  }
  func.func @transform_1(%arg0: i32, %arg1: i32) -> (i32, i32, i32, i32) {
    %c0_i32 = arith.constant 0 : i32
    %c0_i32_0 = arith.constant 0 : i32
    %c0_i32_1 = arith.constant 0 : i32
    %c0_i32_2 = arith.constant 0 : i32
    %c0_i32_3 = arith.constant 0 : i32
    return %c0_i32, %c0_i32_0, %c0_i32_1, %c0_i32_2 : i32, i32, i32, i32
  }
  func.func @transform_2(%arg0: i32, %arg1: i32) -> (i32, i32) {
    %c0_i32 = arith.constant 0 : i32
    %c0_i32_0 = arith.constant 0 : i32
    %c0_i32_1 = arith.constant 0 : i32
    return %c0_i32, %c0_i32_0 : i32, i32
  }
  func.func @transform_3(%arg0: i32, %arg1: i32) -> (i32, i32) {
    %c0_i32 = arith.constant 0 : i32
    %c0_i32_0 = arith.constant 0 : i32
    %c0_i32_1 = arith.constant 0 : i32
    return %c0_i32, %c0_i32_0 : i32, i32
  }
  func.func @transform_4(%arg0: i32, %arg1: i32) -> (i32, i32) {
    %c0_i32 = arith.constant 0 : i32
    %c0_i32_0 = arith.constant 0 : i32
    %c0_i32_1 = arith.constant 0 : i32
    return %c0_i32, %c0_i32_0 : i32, i32
  }
  func.func @transform_5(%arg0: i32, %arg1: i32) -> (i32, i32, i32) {
    %c0_i32 = arith.constant 0 : i32
    %c0_i32_0 = arith.constant 0 : i32
    return %arg0, %c0_i32, %arg1 : i32, i32, i32
  }
}

</mosaic_0001>

<bundles_post_ra>
// kernel: rpn_head_single.1
= control target key start
LH: loop header
LB: loop body
LE: loop exit
PB: predicated region body
PF: predicated region fallthrough
CT: control target
= control target key end

     0   :  { %s1491_s18 = smov 0   ;;  %s1493_s19 = smov 0   ;;  %s1735_s0 = inlined_call_operand.vmem [shape: f32[2,16,256], index: 0, kind: input, shape index: {}]   ;;  %s1736_s1 = inlined_call_operand.vmem [shape: bf16[3,3,16,16], index: 1, kind: input, shape index: {}]   ;;  %s1737_s2 = inlined_call_operand.vmem [shape: f32[16,1], index: 2, kind: input, shape index: {}]   ;;  %s1738_s3 = inlined_call_operand.vmem [shape: bf16[15,16], index: 3, kind: input, shape index: {}]   ;;  %s1739_s4 = inlined_call_operand.vmem [shape: f32[15,1], index: 4, kind: input, shape index: {}]   ;;  %s1740_s5 = inlined_call_operand.vmem [shape: f32[2,15,256], index: 5, kind: output, shape index: {}]  }
   0x1   :  { %s1495_s20 = smov 0  }
   0x2 LB: > { %s27_s21 = sadd.s32 1, %s1446_s19  ;;  %p1302_p0 = scmp.ge.s32.totalorder %s1450_s20, 1  ;;  %s1450_s20 = sphi %s1495_s20, %s15_s20   ;;  %s1446_s19 = sphi %s1493_s19, %s1750_s19   ;;  %s1442_s18 = sphi %s1491_s18, %s1749_s18  }
   0x3   : > { %p29_p1 = scmp.ge.s32.totalorder %s27_s21, 2  ;;  %p208_p2 = scmp.lt.s32.totalorder %s1450_s20, 3 }
   0x5   : > { %s1752_s21 = smov (%p29_p1, %s27_s21), 0  ;;  %p209_p3 = pnand %p1302_p0, %p208_p2 }
   0x6   : > { %p245_p4 = scmp.lt.s32.totalorder (!%p209_p3), %s1442_s18, 1  ;;  %s1453_s26 = smov (!%p209_p3), 111  }
   0x7   : > { %212 = sbr.rel (%p209_p3) target bundleno = 720 (0x2d0), region = 40  ;;  %s1454_s27 = smov (!%p209_p3), 127  }
   0x8   : > { %s1455_s28 = smov (!%p209_p3), 113   ;;  %s1456_s29 = smov (!%p209_p3), 1  }
   0x9   : > { %s1457_s30 = smov (!%p209_p3), 15   ;;  %s1458_s6 = smov (!%p209_p3), 17  }
   0xa   : > { %s1459_s7 = smov (!%p209_p3), 16   ;;  %s1460_s10 = smov (!%p209_p3), 112  }
   0xc   : > { %v291_v0 = vlaneseq  ;;  %vm285_vm0 = vcmask 1044352   ;;  %v1452_v1 = vmov 0   ;;  %vm288_vm1 = vcmask 125952   ;;  %s1754_s18 = smov (!%p245_p4, %s1442_s18), 1 }
   0xd   : > { %286 = vst.msk [vmem:[#allocation2] sm:$0xf] %vm285_vm0, %v1452_v1  ;;  %287 = vst.msk [vmem:[#allocation2 + $0x10] sm:$0xf] %vm285_vm0, %v1452_v1  ;;  %413 = vmatprep.mubr.bf16.mxu0 %v1452_v1  ;;  %488 = vmatprep.mubr.bf16.mxu1 %v1452_v1  ;;  %s1373_s22 = sshll.u32 %s1754_s18, 5  ;;  %vm508_vm10 = vcmask 924672  }
   0xe   : > { %v292_v2 = vand.u32 127, %v291_v0  ;;  %289 = vst.msk [vmem:[#allocation2 + $0xc] sm:$0xf] %vm288_vm1, %v1452_v1  ;;  %290 = vst.msk [vmem:[#allocation2 + $0x1c] sm:$0xf] %vm288_vm1, %v1452_v1  ;;  %1410 = vset.pattern.permute.xlu0 %v1452_v1  ;;  %1411 = vset.pattern.permute.xlu1 %v1452_v1  ;;  %s252_s25 = scalar_lea.vmem %s1735_s0, %s1373_s22  ;;  %vm335_vm11 = vcmask 908288   ;;  %s262_s24 = scalar_lea.vmem %s1740_s5, %s1373_s22 }
   0xf   : > { %v1529_v7 = vld [vmem:[%s252_s25] sm:$0xff]  ;;  %v1531_v8 = vld [vmem:[%s252_s25 + $0x8] sm:$0xff]  ;;  %v1536_v10 = vld [vmem:[%s252_s25 + $0x10] sm:$0xff]  ;;  %vm372_vm15 = vcmask 130048   ;;  %vm601_vm1 = vcmask 1039360  }
  0x10   : > { %v293_v3 = vadd.s32 128, %v292_v2  ;;  %v298_v4 = vand.u32 15, %v292_v2  ;;  %v1538_v11 = vld [vmem:[%s252_s25 + $0x18] sm:$0xff]  ;;  %v1542_v12 = vpack.c.bf16 %v1531_v8, %v1529_v7 }
  0x11   : > { %v1549_v14 = vpack.c.bf16 %v1538_v11, %v1536_v10 }
  0x12   : > { %v305_v5 = vand.u32 15, %v293_v3  ;;  %vm318_vm2 = vcmp.gt.s32.totalorder %v298_v4, 0  ;;  %vm1519_vm3 = vcmp.lt.s32.totalorder %v298_v4, 15  ;;  %283 = vst [vmem:[#allocation2 + $0x4] sm:$0xff] %v1542_v12 }
  0x13   : > { %284 = vst [vmem:[#allocation2 + $0x14] sm:$0xff] %v1549_v14 }
  0x14   : > { %vm319_vm4 = vcmp.gt.s32.totalorder %v305_v5, 0  ;;  %vm321_vm5 = vcmp.lt.s32.totalorder %v305_v5, 15  ;;  %v1416_v5 = vld [vmem:[%s1736_s1 + $0x8] sm:$0xff]  }
  0x15   : > { %vm330_vm6 = vmpackc.low %vm319_vm4, %vm318_vm2  ;;  %v1573_v35 = vld [vmem:[#allocation2 + $0xc] sm:$0xf]  ;;  %v1576_v38 = vld [vmem:[#allocation2 + $0x1c] sm:$0xf]  ;;  %vm636_vm2 = vcmask 7168  }
  0x16   : > { %v331_v9 = vsel %vm330_vm6, 65537, %v1452_v1  ;;  %vm503_vm7 = vmpackc.low %vm321_vm5, %vm1519_vm3  ;;  %vm543_vm6 = vcmask 121856  }
  0x17   : > { %332 = vrot.lane.b32.xlu0 %v331_v9, %s1453_s26  ;;  %598 = vrot.lane.b32.xlu1 %v331_v9, %s1454_s27  ;;  %v504_v13 = vsel %vm503_vm7, 65537, %v1452_v1 }
  0x19   : > { %v1557_v15 = vld [vmem:[#allocation2] sm:$0xff]  ;;  %v323_v16 = vld [vmem:[#allocation2 + $0x8] sm:$0xf] }
  0x1a   : > { %v1559_v17 = vld [vmem:[#allocation2 + $0x10] sm:$0xff]  ;;  %v325_v18 = vld [vmem:[#allocation2 + $0x18] sm:$0xf] }
  0x1b   : > { %505 = vrot.lane.b32.xlu0 %v504_v13, %s1455_s28  ;;  %765 = vrot.lane.b32.xlu1 %v504_v13, %s1456_s29  ;;  %v1313_v19 = vcombine.high %v1557_v15, %v1559_v17  ;;  %v1314_v20 = vcombine.low %v323_v16, %v325_v18  ;;  %v1312_v21 = vcombine.low %v1557_v15, %v1559_v17 }
  0x1f   : > { %856 = vrot.lane.b32.xlu0 %v331_v9, %s1457_s30  ;;  %1029 = vrot.lane.b32.xlu1 %v504_v13, %s1458_s6 }
  0x23   : > { %368 = vrot.lane.b32.xlu0 %v1313_v19, %s1459_s7  ;;  %370 = vrot.lane.b32.xlu1 %v1314_v20, %s1459_s7 }
  0x27   : > { %366 = vrot.lane.b32.xlu0 %v1312_v21, %s1459_s7 }
  0x89   : > { %v333_v22 = vpop.permute.xlu0 %332  ;;  %v599_v23 = vpop.permute.xlu1 %598 }
  0x8a   : > { %v334_v24 = vrot.slane %v333_v22, 4  ;;  %v600_v25 = vrot.slane %v599_v23, 4 }
  0x8c   : > { %vm338_vm8 = vcmp.ne.s16.totalorder %v334_v24, 0  ;;  %vm1565_vm9 = vcmp.ne.s16.totalorder %v600_v25, 0  ;;  %v336_v45 = vsel %vm335_vm11, %v334_v24, %v333_v22  ;;  %v602_v60 = vsel %vm601_vm1, %v600_v25, %v599_v23 }
  0x8d   : > { %v340_v27 = vsel %vm338_vm8, %v323_v16, 0  ;;  %v342_v28 = vsel %vm338_vm8, %v325_v18, 0  ;;  %v506_v29 = vpop.permute.xlu0 %505  ;;  %v766_v30 = vpop.permute.xlu1 %765  ;;  %v606_v31 = vsel %vm1565_vm9, %v323_v16, 0  ;;  %v608_v32 = vsel %vm1565_vm9, %v325_v18, 0 }
  0x8e   : > { %v507_v33 = vrot.slane %v506_v29, 4  ;;  %v767_v34 = vrot.slane %v766_v30, 4  ;;  %v1319_v36 = vcombine.low %v340_v27, %v342_v28  ;;  %v1333_v44 = vcombine.low %v606_v31, %v608_v32 }
  0x8f   : > { %vm337_vm0 = vcmp.ne.s16.totalorder %v336_v45, 0  ;;  %vm603_vm4 = vcmp.ne.s16.totalorder %v602_v60, 0  ;;  %v1426_v23 = vpack.c.bf16 %v1538_v11, %v1531_v8  ;;  %v1360_v24 = vcombine.low %v1573_v35, %v1576_v38 }
  0x90   : > { %v509_v37 = vsel %vm508_vm10, %v507_v33, %v506_v29  ;;  %vm511_vm12 = vcmp.ne.s16.totalorder %v507_v33, 0  ;;  %vm1578_vm13 = vcmp.ne.s16.totalorder %v767_v34, 0  ;;  %446 = vrot.lane.b32.xlu0 %v1319_v36, %s1458_s6  ;;  %v339_v58 = vsel %vm337_vm0, %v1557_v15, 0 }
  0x91   : > { %v857_v40 = vpop.permute.xlu0 %856  ;;  %v1582_v41 = vpop.permute.xlu1 %1029  ;;  %vm510_vm14 = vcmp.ne.s16.totalorder %v509_v37, 0  ;;  %v513_v42 = vsel %vm511_vm12, %v323_v16, 0  ;;  %v515_v43 = vsel %vm511_vm12, %v325_v18, 0  ;;  %v772_v46 = vsel %vm1578_vm13, %v1573_v35, 0 }
  0x92   : > { %v774_v47 = vsel %vm1578_vm13, %v1576_v38, 0  ;;  %v1326_v48 = vcombine.low %v513_v42, %v515_v43  ;;  %v512_v49 = vsel %vm510_vm14, %v1557_v15, 0  ;;  %v514_v50 = vsel %vm510_vm14, %v1559_v17, 0 }
  0x93   : > { %v858_v51 = vrot.slane %v857_v40, 4  ;;  %v1346_v54 = vcombine.low %v772_v46, %v774_v47  ;;  %v1325_v56 = vcombine.high %v512_v49, %v514_v50  ;;  %v341_v59 = vsel %vm337_vm0, %v1559_v17, 0  ;;  %v1417_v47 = vld [vmem:[%s1736_s1 + $0x10] sm:$0xff]  }
  0x94   : > { %541 = vrot.lane.b32.xlu1 %v1326_v48, %s1457_s30  ;;  %634 = vrot.lane.b32.xlu0 %v1333_v44, %s1456_s29  ;;  %v768_v61 = vsel %vm636_vm2, %v767_v34, %v766_v30  ;;  %v1324_v2 = vcombine.low %v512_v49, %v514_v50  ;;  %v1318_v3 = vcombine.high %v339_v58, %v341_v59  ;;  %v605_v13 = vsel %vm603_vm4, %v1557_v15, 0 }
  0x95   : > { %v369_v52 = vpop.permute.xlu0 %368  ;;  %v371_v53 = vpop.permute.xlu1 %370  ;;  %vm1597_vm3 = vcmp.ne.s16.totalorder %v858_v51, 0  ;;  %vm769_vm5 = vcmp.ne.s16.totalorder %v768_v61, 0  ;;  %v1317_v9 = vcombine.low %v339_v58, %v341_v59  ;;  %v607_v16 = vsel %vm603_vm4, %v1559_v17, 0  ;;  %v1420_v59 = vld [vmem:[%s1736_s1 + $0x18] sm:$0xff]  }
  0x96   : > { %v374_v55 = vsel %vm372_vm15, %v369_v52, %v371_v53  ;;  %v863_v62 = vsel %vm1597_vm3, %v1573_v35, 0  ;;  %v865_v63 = vsel %vm1597_vm3, %v1576_v38, 0  ;;  %v771_v18 = vsel %vm769_vm5, %v1542_v12, 0 }
  0x97   : > { %395 = vmatprep.subr.bf16.mxu0 %v374_v55  ;;  %v1353_v6 = vcombine.low %v863_v62, %v865_v63  ;;  %v773_v19 = vsel %vm769_vm5, %v1549_v14, 0  ;;  %v1332_v21 = vcombine.high %v605_v13, %v607_v16  ;;  %v859_v15 = vsel %vm543_vm6, %v858_v51, %v857_v40  ;;  %v1418_v51 = vld [vmem:[%s1736_s1] sm:$0xff]  }
  0x98   : > { %800 = vrot.lane.b32.xlu1 %v1346_v54, %s1454_s27  ;;  %539 = vrot.lane.b32.xlu0 %v1325_v56, %s1457_s30  ;;  %v1345_v20 = vcombine.high %v771_v18, %v773_v19  ;;  %v1344_v17 = vcombine.low %v771_v18, %v773_v19  ;;  %v1331_v22 = vcombine.low %v605_v13, %v607_v16  ;;  %vm860_vm7 = vcmp.ne.s16.totalorder %v859_v15, 0  ;;  %v1419_v55 = vld [vmem:[%s1736_s1 + $0x20] sm:$0xff]   ;;  %v1422_v16 = vld [vmem:[%s1736_s1 + $0x30] sm:$0xff]  }
  0x99   : > { %v367_v0 = vpop.permute.xlu0 %366  ;;  %v1031_v25 = vrot.slane %v1582_v41, 4  ;;  %vm448_vm8 = vcmask 138240   ;;  %v862_v26 = vsel %vm860_vm7, %v1542_v12, 0  ;;  %v864_v27 = vsel %vm860_vm7, %v1549_v14, 0 }
  0x9a   : > { %v373_v4 = vsel %vm372_vm15, %v367_v0, %v369_v52  ;;  %v1427_v28 = vpack.c.bf16 %v1536_v10, %v1529_v7  ;;  %v1352_v30 = vcombine.high %v862_v26, %v864_v27  ;;  %v1351_v32 = vcombine.low %v862_v26, %v864_v27  ;;  %v1120_v7 = vld [vmem:[%s1737_s2] sm:$0xff] }
  0x9b   : > { %396 = vmatpush1.bf16.msra.mxu0 %v373_v4  ;;  %vm1034_vm9 = vcmp.ne.s16.totalorder %v1031_v25, 0  ;;  %v1032_v8 = vsel %vm448_vm8, %v1031_v25, %v1582_v41  ;;  %vm974_vm13 = vcmask 916480  }
  0x9c   : > { %537 = vrot.lane.b32.xlu0 %v1324_v2, %s1457_s30  ;;  %444 = vrot.lane.b32.xlu1 %v1318_v3, %s1458_s6  ;;  %v1036_v11 = vsel %vm1034_vm9, %v1573_v35, 0  ;;  %v1038_v29 = vsel %vm1034_vm9, %v1576_v38, 0  ;;  %vm1033_vm12 = vcmp.ne.s16.totalorder %v1032_v8, 0  ;;  %v1145_v35 = vld [vmem:[%s1739_s4 + $0x8] sm:$0x7f] }
  0x9d   : > { %v1367_v31 = vcombine.low %v1036_v11, %v1038_v29  ;;  %v1035_v33 = vsel %vm1033_vm12, %v1542_v12, 0  ;;  %v1037_v34 = vsel %vm1033_vm12, %v1549_v14, 0  ;;  %v1121_v12 = vld [vmem:[%s1737_s2 + $0x8] sm:$0xff]  ;;  %v1144_v14 = vld [vmem:[%s1739_s4] sm:$0xff] }
  0x9e   : > { %1315 = vmatmul.mubr.msk.bf16.vlgmr.msra.gmra.mxu0 %vm372_vm15, %v1416_v5  ;;  %v1366_v10 = vcombine.high %v1035_v33, %v1037_v34  ;;  %v1365_v36 = vcombine.low %v1035_v33, %v1037_v34  ;;  %v1421_v5 = vld [vmem:[%s1736_s1 + $0x28] sm:$0xff]  }
  0x9f   : > { %583 = vmatprep.mubr.bf16.mxu0 %v1452_v1 }
  0xa0   : > { %891 = vrot.lane.b32.xlu0 %v1353_v6, %s1455_s28  ;;  %442 = vrot.lane.b32.xlu1 %v1317_v9, %s1458_s6 }
  0xa4   : > { %798 = vrot.lane.b32.xlu0 %v1345_v20, %s1454_s27  ;;  %632 = vrot.lane.b32.xlu1 %v1332_v21, %s1456_s29  ;;  %v1423_v21 = vld [vmem:[%s1736_s1 + $0x38] sm:$0xff]  }
  0xa8   : > { %796 = vrot.lane.b32.xlu0 %v1344_v17, %s1454_s27  ;;  %630 = vrot.lane.b32.xlu1 %v1331_v22, %s1456_s29  ;;  %v1424_v22 = vld [vmem:[%s1736_s1 + $0x40] sm:$0xff]  }
  0xac   : > { %970 = vrot.lane.b32.xlu0 %v1426_v23, %s1460_s10  ;;  %972 = vrot.lane.b32.xlu1 %v1360_v24, %s1460_s10 }
  0xb0   : > { %889 = vrot.lane.b32.xlu1 %v1352_v30, %s1455_s28  ;;  %968 = vrot.lane.b32.xlu0 %v1427_v28, %s1460_s10 }
  0xb4   : > { %887 = vrot.lane.b32.xlu1 %v1351_v32, %s1455_s28  ;;  %1064 = vrot.lane.b32.xlu0 %v1367_v31, %s1453_s26 }
  0xb8   : > { %1062 = vrot.lane.b32.xlu1 %v1366_v10, %s1453_s26  ;;  %1124 = vperm.xlu0 %1410, %v1120_v7  }
  0xbc   : > { %1060 = vrot.lane.b32.xlu1 %v1365_v36, %s1453_s26  ;;  %1153 = vperm.xlu0 %1410, %v1145_v35  }
  0xc0   : > { %1129 = vperm.xlu1 %1411, %v1121_v12  }
  0xc4   : > { %1148 = vperm.xlu1 %1411, %v1144_v14  }
 0x102   : > { %v447_v37 = vpop.permute.xlu0 %446 }
 0x106   : > { %v542_v38 = vpop.permute.xlu1 %541  ;;  %v635_v39 = vpop.permute.xlu0 %634 }
 0x10a   : > { %v801_v40 = vpop.permute.xlu1 %800  ;;  %v540_v41 = vpop.permute.xlu0 %539 }
 0x10b   : > { %v545_v42 = vsel %vm543_vm6, %v540_v41, %v542_v38 }
 0x10c   : > { %565 = vmatprep.subr.bf16.mxu0 %v545_v42 }
 0x10e   : > { %v538_v43 = vpop.permute.xlu0 %537  ;;  %v445_v44 = vpop.permute.xlu1 %444 }
 0x10f   : > { %v544_v45 = vsel %vm543_vm6, %v538_v43, %v540_v41  ;;  %v450_v46 = vsel %vm448_vm8, %v445_v44, %v447_v37 }
 0x110   : > { %470 = vmatprep.subr.bf16.mxu1 %v450_v46  ;;  %566 = vmatpush1.bf16.msra.mxu0 %v544_v45 }
 0x111   : > { %728 = vmatprep.subr.bf16.mxu0 %v1426_v23 }
 0x112   : > { %v892_v48 = vpop.permute.xlu0 %891  ;;  %v443_v49 = vpop.permute.xlu1 %442 }
 0x113   : > { %v449_v50 = vsel %vm448_vm8, %v443_v49, %v445_v44  ;;  %1327 = vmatmul.mubr.msk.bf16.vlgmr.msra.gmra.mxu0 %vm372_vm15, %v1417_v47 }
 0x114   : > { %471 = vmatpush1.bf16.msra.mxu1 %v449_v50  ;;  %729 = vmatpush1.bf16.msra.mxu0 %v1427_v28 }
 0x115   : > { %746 = vmatprep.mubr.bf16.mxu0 %v1452_v1 }
 0x116   : > { %v799_v52 = vpop.permute.xlu0 %798  ;;  %v633_v53 = vpop.permute.xlu1 %632 }
 0x117   : > { %1320 = vmatmul.mubr.msk.bf16.vlgmr.msra.gmra.mxu1 %vm372_vm15, %v1418_v51  ;;  %v638_v54 = vsel %vm636_vm2, %v633_v53, %v635_v39  ;;  %v803_v60 = vsel %vm601_vm1, %v799_v52, %v801_v40 }
 0x118   : > { %658 = vmatprep.subr.bf16.mxu1 %v638_v54  ;;  %676 = vmatprep.mubr.bf16.mxu1 %v1452_v1 }
 0x11a   : > { %v797_v56 = vpop.permute.xlu0 %796  ;;  %v631_v57 = vpop.permute.xlu1 %630 }
 0x11b   : > { %v637_v58 = vsel %vm636_vm2, %v631_v57, %v633_v53  ;;  %1340 = vmatmul.mubr.msk.bf16.vlgmr.msra.gmra.mxu0 %vm372_vm15, %v1419_v55  ;;  %v802_v63 = vsel %vm601_vm1, %v797_v56, %v799_v52 }
 0x11c   : > { %659 = vmatpush1.bf16.msra.mxu1 %v637_v58  ;;  %932 = vmatprep.mubr.bf16.mxu0 %v1452_v1 }
 0x11d   : > { %823 = vmatprep.subr.bf16.mxu1 %v803_v60 }
 0x11e   : > { %v971_v61 = vpop.permute.xlu0 %970  ;;  %v973_v62 = vpop.permute.xlu1 %972 }
 0x11f   : > { %1334 = vmatmul.mubr.msk.bf16.vlgmr.msra.gmra.mxu1 %vm372_vm15, %v1420_v59  ;;  %v976_v0 = vsel %vm974_vm13, %v971_v61, %v973_v62 }
 0x120   : > { %824 = vmatpush1.bf16.msra.mxu1 %v802_v63  ;;  %841 = vmatprep.mubr.bf16.mxu1 %v1452_v1 }
 0x121   : > { %996 = vmatprep.subr.bf16.mxu1 %v976_v0 }
 0x122   : > { %v890_v2 = vpop.permute.xlu1 %889  ;;  %v969_v3 = vpop.permute.xlu0 %968 }
 0x123   : > { %v894_v4 = vsel %vm508_vm10, %v890_v2, %v892_v48  ;;  %v975_v6 = vsel %vm974_vm13, %v969_v3, %v971_v61 }
 0x124   : > { %914 = vmatprep.subr.bf16.mxu0 %v894_v4 }
 0x126   : > { %v888_v9 = vpop.permute.xlu1 %887  ;;  %v1065_v18 = vpop.permute.xlu0 %1064 }
 0x127   : > { %v893_v13 = vsel %vm508_vm10, %v888_v9, %v890_v2  ;;  %1347 = vmatmul.mubr.msk.bf16.vlgmr.msra.gmra.mxu1 %vm372_vm15, %v1421_v5 }
 0x128   : > { %997 = vmatpush1.bf16.msra.mxu1 %v975_v6  ;;  %915 = vmatpush1.bf16.msra.mxu0 %v893_v13 }
 0x129   : > { %1014 = vmatprep.mubr.bf16.mxu1 %v1452_v1 }
 0x12a   : > { %v1063_v19 = vpop.permute.xlu1 %1062 }
 0x12b   : > { %1354 = vmatmul.mubr.msk.bf16.vlgmr.msra.gmra.mxu0 %vm372_vm15, %v1422_v16  ;;  %v1067_v20 = vsel %vm335_vm11, %v1063_v19, %v1065_v18 }
 0x12c   : > { %1087 = vmatprep.subr.bf16.mxu0 %v1067_v20  ;;  %1105 = vmatprep.mubr.bf16.mxu0 %v1452_v1 }
 0x12e   : > { %v1061_v15 = vpop.permute.xlu1 %1060 }
 0x12f   : > { %v1066_v17 = vsel %vm335_vm11, %v1061_v15, %v1063_v19  ;;  %1361 = vmatmul.mubr.msk.bf16.vlgmr.msra.gmra.mxu1 %vm372_vm15, %v1423_v21 }
 0x130   : > { %1088 = vmatpush1.bf16.msra.mxu0 %v1066_v17  ;;  %1196 = vmatprep.mubr.bf16.mxu1 %v1452_v1 }
 0x133   : > { %1368 = vmatmul.mubr.msk.bf16.vlgmr.msra.gmra.mxu0 %vm372_vm15, %v1424_v22 }
 0x15e   : > { %v415_v23 = vpop.f32.mrf.mxu0 }
 0x160   : > { %v417_v24 = vpop.f32.mrf.mxu0 }
 0x162   : > { %v419_v25 = vpop.f32.mrf.mxu0 }
 0x164   : > { %v421_v26 = vpop.f32.mrf.mxu0 }
 0x1d3   : > { %v585_v27 = vpop.f32.mrf.mxu0 }
 0x1d5   : > { %v587_v28 = vpop.f32.mrf.mxu0 }
 0x1d7   : > { %v490_v8 = vpop.f32.mrf.mxu1  ;;  %v589_v11 = vpop.f32.mrf.mxu0 }
 0x1d8   : > { %v491_v36 = vadd.f32 %v490_v8, %v415_v23  ;;  %v1125_v23 = vpop.permute.xlu0 %1124 }
 0x1d9   : > { %v492_v29 = vpop.f32.mrf.mxu1  ;;  %v591_v30 = vpop.f32.mrf.mxu0 }
 0x1da   : > { %v493_v1 = vadd.f32 %v492_v29, %v417_v24  ;;  %v594_v41 = vadd.f32 %v585_v27, %v491_v36 }
 0x1db   : > { %v494_v31 = vpop.f32.mrf.mxu1  ;;  %v748_v33 = vpop.f32.mrf.mxu0 }
 0x1dc   : > { %v495_v37 = vadd.f32 %v494_v31, %v419_v25  ;;  %v595_v40 = vadd.f32 %v587_v28, %v493_v1 }
 0x1dd   : > { %v496_v32 = vpop.f32.mrf.mxu1  ;;  %v750_v7 = vpop.f32.mrf.mxu0 }
 0x1de   : > { %v497_v39 = vadd.f32 %v496_v32, %v421_v26  ;;  %v596_v45 = vadd.f32 %v589_v11, %v495_v37  ;;  %v1130_v26 = vpop.permute.xlu1 %1129 }
 0x1df   : > { %v678_v34 = vpop.f32.mrf.mxu1  ;;  %v752_v12 = vpop.f32.mrf.mxu0 }
 0x1e0   : > { %v687_v46 = vadd.f32 %v678_v34, %v594_v41  ;;  %v597_v50 = vadd.f32 %v591_v30, %v497_v39 }
 0x1e1   : > { %v680_v10 = vpop.f32.mrf.mxu1  ;;  %v754_v42 = vpop.f32.mrf.mxu0 }
 0x1e2   : > { %v688_v44 = vadd.f32 %v680_v10, %v595_v40  ;;  %v757_v55 = vadd.f32 %v748_v33, %v687_v46  ;;  %v1149_v1 = vpop.permute.xlu1 %1148 }
 0x1e3   : > { %v682_v35 = vpop.f32.mrf.mxu1 }
 0x1e4   : > { %v689_v49 = vadd.f32 %v682_v35, %v596_v45  ;;  %v758_v54 = vadd.f32 %v750_v7, %v688_v44  ;;  %v1425_v35 = vld [vmem:[%s1738_s3] sm:$0xff]  }
 0x1e5   : > { %v684_v14 = vpop.f32.mrf.mxu1 }
 0x1e6   : > { %v690_v53 = vadd.f32 %v684_v14, %v597_v50  ;;  %v759_v59 = vadd.f32 %v752_v12, %v689_v49 }
 0x1e7   : > { %v843_v38 = vpop.f32.mrf.mxu1 }
 0x1e8   : > { %v852_v60 = vadd.f32 %v843_v38, %v757_v55  ;;  %v760_v0 = vadd.f32 %v754_v42, %v690_v53  ;;  %v1154_v38 = vpop.permute.xlu0 %1153 }
 0x1e9   : > { %v845_v43 = vpop.f32.mrf.mxu1 }
 0x1ea   : > { %v853_v58 = vadd.f32 %v845_v43, %v758_v54 }
 0x1eb   : > { %v847_v47 = vpop.f32.mrf.mxu1  ;;  %v934_v48 = vpop.f32.mrf.mxu0 }
 0x1ec   : > { %v854_v63 = vadd.f32 %v847_v47, %v759_v59  ;;  %v943_v3 = vadd.f32 %v934_v48, %v852_v60 }
 0x1ed   : > { %v849_v51 = vpop.f32.mrf.mxu1  ;;  %v936_v52 = vpop.f32.mrf.mxu0 }
 0x1ee   : > { %v944_v2 = vadd.f32 %v936_v52, %v853_v58  ;;  %v855_v6 = vadd.f32 %v849_v51, %v760_v0 }
 0x1ef   : > { %v938_v56 = vpop.f32.mrf.mxu0  ;;  %v1016_v57 = vpop.f32.mrf.mxu1 }
 0x1f0   : > { %v945_v9 = vadd.f32 %v938_v56, %v854_v63  ;;  %v1025_v16 = vadd.f32 %v1016_v57, %v943_v3 }
 0x1f1   : > { %v940_v61 = vpop.f32.mrf.mxu0  ;;  %v1018_v62 = vpop.f32.mrf.mxu1 }
 0x1f2   : > { %v1026_v13 = vadd.f32 %v1018_v62, %v944_v2  ;;  %v946_v20 = vadd.f32 %v940_v61, %v855_v6 }
 0x1f3   : > { %v1020_v4 = vpop.f32.mrf.mxu1  ;;  %v1107_v5 = vpop.f32.mrf.mxu0 }
 0x1f4   : > { %v1027_v21 = vadd.f32 %v1020_v4, %v945_v9  ;;  %v1116_v17 = vadd.f32 %v1107_v5, %v1025_v16 }
 0x1f5   : > { %v1022_v18 = vpop.f32.mrf.mxu1  ;;  %v1109_v19 = vpop.f32.mrf.mxu0 }
 0x1f6   : > { %v1117_v15 = vadd.f32 %v1109_v19, %v1026_v13  ;;  %v1028_v24 = vadd.f32 %v1022_v18, %v946_v20  ;;  %v1132_v29 = vadd.f32 %v1125_v23, %v1116_v17 }
 0x1f7   : > { %v1111_v22 = vpop.f32.mrf.mxu0 }
 0x1f8   : > { %v1118_v25 = vadd.f32 %v1111_v22, %v1027_v21  ;;  %v1133_v28 = vadd.f32 %v1125_v23, %v1117_v15  ;;  %v1136_v34 = vmax.f32 %v1132_v29, 0.0 }
 0x1f9   : > { %v1113_v27 = vpop.f32.mrf.mxu0 }
 0x1fa   : > { %v1134_v8 = vadd.f32 %v1130_v26, %v1118_v25  ;;  %v1119_v11 = vadd.f32 %v1113_v27, %v1028_v24  ;;  %v1137_v32 = vmax.f32 %v1133_v28, 0.0 }
 0x1fc   : > { %v1135_v30 = vadd.f32 %v1130_v26, %v1119_v11  ;;  %v1138_v31 = vmax.f32 %v1134_v8, 0.0 }
 0x1fe   : > { %v1139_v33 = vmax.f32 %v1135_v30, 0.0  ;;  %v1140_v10 = vpack.c.bf16 %v1138_v31, %v1136_v34 }
 0x200   : > { %v1141_v7 = vpack.c.bf16 %v1139_v33, %v1137_v32 }
 0x202   : > { %1178 = vmatprep.subr.bf16.mxu1 %v1141_v7 }
 0x203   : > { %1179 = vmatpush1.bf16.msra.mxu1 %v1140_v10 }
 0x206   : > { %1370 = vmatmul.mubr.msk.bf16.vlgmr.msra.gmra.mxu1 %vm372_vm15, %v1425_v35 }
 0x2c6   : > { %v1198_v36 = vpop.f32.mrf.mxu1 }
 0x2c7   : > { %v1199_v12 = vadd.f32 %v1198_v36, %v1149_v1 }
 0x2c8   : > { %v1200_v14 = vpop.f32.mrf.mxu1 }
 0x2c9   : > { %1207 = vst [vmem:[%s262_s24] sm:$0xff] %v1199_v12  ;;  %v1201_v37 = vadd.f32 %v1200_v14, %v1149_v1 }
 0x2ca   : > { %v1202_v39 = vpop.f32.mrf.mxu1 }
 0x2cb   : > { %1208 = vst [vmem:[%s262_s24 + $0x8] sm:$0xff] %v1201_v37  ;;  %v1203_v40 = vadd.f32 %v1202_v39, %v1154_v38 }
 0x2cc   : > { %v1204_v41 = vpop.f32.mrf.mxu1 }
 0x2cd   : > { %1209 = vst [vmem:[%s262_s24 + $0x10] sm:$0x7f] %v1203_v40  ;;  %v1205_v42 = vadd.f32 %v1204_v41, %v1154_v38 }
 0x2cf   : > { %1210 = vst [vmem:[%s262_s24 + $0x18] sm:$0x7f] %v1205_v42 }
 0x2d0 PF: > { %s15_s20 = sadd.s32 1, %s1450_s20   ;;  %s1749_s18 = smov %s1446_s19 }
 0x2d1   : > { %p12_p5 = scmp.ge.s32.totalorder %s15_s20, 4   ;;  %s1750_s19 = smov %s1752_s21 }
 0x2d3   :  { %14 = sbr.rel (!%p12_p5) target bundleno = 2 (0x2), region = 78 }

</bundles_post_ra>
